<compile_context>
chip_gen: v6e
topology: v6e:2x2x1
jax: 0.10.0
libtpu: 0.0.40
codegen_flags: <defaults>
</compile_context>

<pallas_src>
import functools

import jax
import jax.numpy as jnp
from jax.experimental import pallas as pl
from jax.experimental.pallas import tpu as pltpu


def _act_dtype_for_backend():
    """bf16 tanh on bf16-EUP chips (v6e / v7x); f32 elsewhere (v5e and older)."""
    try:
        kind = jax.devices()[0].device_kind.lower()
    except Exception:  # pragma: no cover - conservative fallback
        return jnp.float32
    if ("v6" in kind) or ("v7" in kind) or ("7x" in kind):
        return jnp.bfloat16
    return jnp.float32


def _plan_tiles(batch, block_batch):
    """Pick (padded_batch, tile_lanes), tile a multiple of 128.

    Large tiles (<= 32768 lanes) amortize per-grid-step overhead; an even tile
    count (>= 2 whenever there is enough work) lets the v7x megacore shard the
    'parallel' batch axis across both TensorCores.
    """
    padded0 = max(128, ((batch + 127) // 128) * 128)
    tb_cap = max(128, (min(block_batch, 32768) // 128) * 128)
    n = -(-padded0 // tb_cap)            # ceil-div: tiles needed at the cap
    if padded0 >= 256:
        n = max(n, 2)                    # >= 2 tiles -> use both v7x TCs
    if n > 1 and n % 2:
        n += 1                           # even tile count balances the 2 TCs
    tb = -(-padded0 // (n * 128)) * 128  # per-tile lanes, multiple of 128
    return n * tb, tb


def mlp_kernel(x_ref, w1_ref, b1_ref, w2_ref, b2_ref, w3_ref, b3_ref, o_ref,
               *, act_dtype):
    """One batch tile: x_ref is [in_dim, TB] (batch on lanes), o_ref is [1, TB]."""
    # Layer 1: tanh(W1 @ x + b1) -> [hidden, TB].  MXU accumulates in f32; the
    # tanh runs in act_dtype (bf16 on v6e/v7x -> packed EUP rate, f32 on v5e).
    z1 = (jnp.dot(w1_ref[...], x_ref[...], preferred_element_type=jnp.float32)
          + b1_ref[...])
    h1 = jnp.tanh(z1.astype(act_dtype))
    # Layer 2: tanh(W2 @ h1 + b2) -> [30, TB]
    z2 = (jnp.dot(w2_ref[...], h1.astype(w2_ref.dtype),
                  preferred_element_type=jnp.float32) + b2_ref[...])
    h2 = jnp.tanh(z2.astype(act_dtype))
    # Layer 3: W3 @ h2 + b3 -> [1, TB]
    o_ref[...] = (jnp.dot(w3_ref[...], h2.astype(w3_ref.dtype),
                          preferred_element_type=jnp.float32)
                  + b3_ref[...]).astype(o_ref.dtype)


@functools.partial(jax.jit, static_argnames=("block_batch",))
def simple_nn_forward(x, params, *, block_batch=32768):
    """Pallas SimpleNN.forward.

    x: [batch, tdim + xdim]  (PyTorch layout)
    params: PyTorch-layout tensors
        (w1 [hidden, in], b1 [hidden], w2 [30, hidden], b2 [30],
         w3 [1, 30],      b3 [1])
    Returns [batch, 1] float32, matching nn.Sequential(...) semantics
    (bf16 storage / f32 MXU accumulation; tanh in bf16 on v6e/v7x).
    """
    w1, b1, w2, b2, w3, b3 = params
    batch, in_dim = x.shape
    hidden = w1.shape[0]

    padded, tb = _plan_tiles(batch, block_batch)
    grid = (padded // tb,)
    act_dtype = _act_dtype_for_backend()

    # Batch on the lane (last) axis, bf16 storage; fused into this jit so the
    # transpose/pad is not a standalone HBM round-trip.
    xt = jnp.pad(x.T.astype(jnp.bfloat16), ((0, 0), (0, padded - batch)))

    w1b = w1.astype(jnp.bfloat16)
    w2b = w2.astype(jnp.bfloat16)
    w3b = w3.astype(jnp.bfloat16)
    b1c = b1.reshape(hidden, 1).astype(jnp.float32)
    b2c = b2.reshape(-1, 1).astype(jnp.float32)
    b3c = b3.reshape(1, 1).astype(jnp.float32)

    def resident(shape):
        # Full-array block with a constant index_map -> loaded once, stays
        # VMEM-resident across all grid steps.
        return pl.BlockSpec(shape, lambda *_i, _n=len(shape): (0,) * _n)

    out_t = pl.pallas_call(
        functools.partial(mlp_kernel, act_dtype=act_dtype),
        out_shape=jax.ShapeDtypeStruct((1, padded), jnp.float32),
        grid=grid,
        in_specs=[
            pl.BlockSpec((in_dim, tb), lambda i: (0, i)),   # lane-dense x tile
            resident(w1b.shape),
            resident(b1c.shape),
            resident(w2b.shape),
            resident(b2c.shape),
            resident(w3b.shape),
            resident(b3c.shape),
        ],
        out_specs=pl.BlockSpec((1, tb), lambda i: (0, i)),
        compiler_params=pltpu.CompilerParams(
            dimension_semantics=("parallel",)),  # shard batch tiles over TCs
    )(xt, w1b, b1c, w2b, b2c, w3b, b3c)

    # Back to PyTorch layout [batch, 1] (sliced/transposed inside the same jit).
    return out_t[:, :batch].T


def init_params(key, tdim, xdim, hidden):
    """Deterministic init with PyTorch nn.Linear shapes ([out, in] weights)."""
    in_dim = tdim + xdim
    ks = jax.random.split(key, 6)

    def u(k, shape, fan_in):
        bound = 1.0 / jnp.sqrt(float(fan_in))
        return jax.random.uniform(k, shape, jnp.float32, -bound, bound)

    w1 = u(ks[0], (hidden, in_dim), in_dim)
    b1 = u(ks[1], (hidden,), in_dim)
    w2 = u(ks[2], (30, hidden), hidden)
    b2 = u(ks[3], (30,), hidden)
    w3 = u(ks[4], (1, 30), 30)
    b3 = u(ks[5], (1,), 30)
    return (w1, b1, w2, b2, w3, b3)


if __name__ == "__main__":
    tdim, xdim, hidden = 1, 2, 32
    batch = 500   # non-multiple of 128: exercises padding AND the >=2-tile plan

    key = jax.random.PRNGKey(0)
    pkey, xkey = jax.random.split(key)
    params = init_params(pkey, tdim, xdim, hidden)

    # Input: [batch, tdim + xdim] (e.g. (t, x) collocation points for the heat eqn).
    x = jax.random.normal(xkey, (batch, tdim + xdim), jnp.float32)

    out = simple_nn_forward(x, params)
    out = jax.block_until_ready(out)

    # Pure-JAX reference mirroring the kernel's dtype policy: bf16 storage,
    # f32 MXU accumulation, tanh in the backend-selected activation dtype.
    w1, b1, w2, b2, w3, b3 = params
    act = _act_dtype_for_backend()
    bf = lambda a: a.astype(jnp.bfloat16)
    z1 = jnp.dot(bf(x), bf(w1).T, preferred_element_type=jnp.float32) + b1
    h1 = jnp.tanh(z1.astype(act))
    z2 = jnp.dot(bf(h1), bf(w2).T, preferred_element_type=jnp.float32) + b2
    h2 = jnp.tanh(z2.astype(act))
    ref = jnp.dot(bf(h2), bf(w3).T, preferred_element_type=jnp.float32) + b3

    assert out.shape == (batch, 1)
    assert out.dtype == jnp.float32
    # Tolerance covers bf16-tanh ulp differences between the EUP and XLA paths.
    assert jnp.allclose(out, ref, atol=3e-2, rtol=3e-2), float(
        jnp.max(jnp.abs(out - ref)))

    print("KERNEL_OK")
</pallas_src>

<mosaic_0001>
module attributes {stable_mosaic.version = 11 : i64} {
  func.func @mlp_kernel(%arg0: i32, %arg1: memref<3x256xbf16, #tpu.memory_space<vmem>>, %arg2: memref<32x3xbf16, #tpu.memory_space<vmem>>, %arg3: memref<32x1xf32, #tpu.memory_space<vmem>>, %arg4: memref<30x32xbf16, #tpu.memory_space<vmem>>, %arg5: memref<30x1xf32, #tpu.memory_space<vmem>>, %arg6: memref<1x30xbf16, #tpu.memory_space<vmem>>, %arg7: memref<1x1xf32, #tpu.memory_space<vmem>>, %arg8: memref<1x256xf32, #tpu.memory_space<vmem>>) attributes {dimension_semantics = [#tpu.dimension_semantics<parallel>], iteration_bounds = array<i64: 2>, scalar_prefetch = 0 : i64, scratch_operands = 0 : i64, tpu.core_type = #tpu.core_type<tc>, window_params = [{transform_indices = @transform_0, window_bounds = array<i64: 3, 256>}, {pipeline_mode = #tpu.pipeline_mode<synchronous>, transform_indices = @transform_1, window_bounds = array<i64: 32, 3>}, {pipeline_mode = #tpu.pipeline_mode<synchronous>, transform_indices = @transform_2, window_bounds = array<i64: 32, 1>}, {pipeline_mode = #tpu.pipeline_mode<synchronous>, transform_indices = @transform_3, window_bounds = array<i64: 30, 32>}, {pipeline_mode = #tpu.pipeline_mode<synchronous>, transform_indices = @transform_4, window_bounds = array<i64: 30, 1>}, {pipeline_mode = #tpu.pipeline_mode<synchronous>, transform_indices = @transform_5, window_bounds = array<i64: 1, 30>}, {pipeline_mode = #tpu.pipeline_mode<synchronous>, transform_indices = @transform_6, window_bounds = array<i64: 1, 1>}, {transform_indices = @transform_7, window_bounds = array<i64: 1, 256>}]} {
    %c0 = arith.constant 0 : index
    %c0_0 = arith.constant 0 : index
    %0 = vector.load %arg2[%c0, %c0_0] : memref<32x3xbf16, #tpu.memory_space<vmem>>, vector<32x3xbf16>
    %c0_1 = arith.constant 0 : index
    %c0_2 = arith.constant 0 : index
    %1 = vector.load %arg1[%c0_1, %c0_2] : memref<3x256xbf16, #tpu.memory_space<vmem>>, vector<3x256xbf16>
    %cst = arith.constant dense<0.000000e+00> : vector<32x256xf32>
    %2 = tpu.matmul %0, %1, %cst {dimension_numbers = #tpu.dot_dimension_numbers<[1], [0], [0], [1], [0, 0, 1, 1], [], []>} : vector<32x3xbf16>, vector<3x256xbf16>, vector<32x256xf32> -> vector<32x256xf32>
    %c0_3 = arith.constant 0 : index
    %c0_4 = arith.constant 0 : index
    %3 = vector.load %arg3[%c0_3, %c0_4] : memref<32x1xf32, #tpu.memory_space<vmem>>, vector<32x1xf32>
    %4 = vector.broadcast %3 : vector<32x1xf32> to vector<32x256xf32>
    %5 = arith.addf %2, %4 : vector<32x256xf32>
    %6 = math.tanh %5 : vector<32x256xf32>
    %c0_5 = arith.constant 0 : index
    %c0_6 = arith.constant 0 : index
    %7 = vector.load %arg4[%c0_5, %c0_6] : memref<30x32xbf16, #tpu.memory_space<vmem>>, vector<30x32xbf16>
    %8 = arith.truncf %6 : vector<32x256xf32> to vector<32x256xbf16>
    %cst_7 = arith.constant dense<0.000000e+00> : vector<30x256xf32>
    %9 = tpu.matmul %7, %8, %cst_7 {dimension_numbers = #tpu.dot_dimension_numbers<[1], [0], [0], [1], [0, 0, 1, 1], [], []>} : vector<30x32xbf16>, vector<32x256xbf16>, vector<30x256xf32> -> vector<30x256xf32>
    %c0_8 = arith.constant 0 : index
    %c0_9 = arith.constant 0 : index
    %10 = vector.load %arg5[%c0_8, %c0_9] : memref<30x1xf32, #tpu.memory_space<vmem>>, vector<30x1xf32>
    %11 = vector.broadcast %10 : vector<30x1xf32> to vector<30x256xf32>
    %12 = arith.addf %9, %11 : vector<30x256xf32>
    %13 = math.tanh %12 : vector<30x256xf32>
    %c0_10 = arith.constant 0 : index
    %c0_11 = arith.constant 0 : index
    %14 = vector.load %arg6[%c0_10, %c0_11] : memref<1x30xbf16, #tpu.memory_space<vmem>>, vector<1x30xbf16>
    %15 = arith.truncf %13 : vector<30x256xf32> to vector<30x256xbf16>
    %cst_12 = arith.constant dense<0.000000e+00> : vector<1x256xf32>
    %16 = tpu.matmul %14, %15, %cst_12 {dimension_numbers = #tpu.dot_dimension_numbers<[1], [0], [0], [1], [0, 0, 1, 1], [], []>} : vector<1x30xbf16>, vector<30x256xbf16>, vector<1x256xf32> -> vector<1x256xf32>
    %c0_13 = arith.constant 0 : index
    %c0_14 = arith.constant 0 : index
    %17 = vector.load %arg7[%c0_13, %c0_14] : memref<1x1xf32, #tpu.memory_space<vmem>>, vector<1x1xf32>
    %18 = vector.broadcast %17 : vector<1x1xf32> to vector<1x256xf32>
    %19 = arith.addf %16, %18 : vector<1x256xf32>
    %c0_15 = arith.constant 0 : index
    %c0_16 = arith.constant 0 : index
    %20 = vector.load %arg8[%c0_15, %c0_16] : memref<1x256xf32, #tpu.memory_space<vmem>>, vector<1x256xf32>
    tpu.vector_store %arg8[%c0_15, %c0_16], %19 {strides = array<i32>} : memref<1x256xf32, #tpu.memory_space<vmem>>, vector<1x256xf32>,
    return
  }
  func.func @transform_0(%arg0: i32) -> (i32, i32) {
    %c0_i32 = arith.constant 0 : i32
    %c0_i32_0 = arith.constant 0 : i32
    return %c0_i32, %arg0 : i32, i32
  }
  func.func @transform_1(%arg0: i32) -> (i32, i32) {
    %c0_i32 = arith.constant 0 : i32
    %c0_i32_0 = arith.constant 0 : i32
    %c0_i32_1 = arith.constant 0 : i32
    return %c0_i32, %c0_i32_0 : i32, i32
  }
  func.func @transform_2(%arg0: i32) -> (i32, i32) {
    %c0_i32 = arith.constant 0 : i32
    %c0_i32_0 = arith.constant 0 : i32
    %c0_i32_1 = arith.constant 0 : i32
    return %c0_i32, %c0_i32_0 : i32, i32
  }
  func.func @transform_3(%arg0: i32) -> (i32, i32) {
    %c0_i32 = arith.constant 0 : i32
    %c0_i32_0 = arith.constant 0 : i32
    %c0_i32_1 = arith.constant 0 : i32
    return %c0_i32, %c0_i32_0 : i32, i32
  }
  func.func @transform_4(%arg0: i32) -> (i32, i32) {
    %c0_i32 = arith.constant 0 : i32
    %c0_i32_0 = arith.constant 0 : i32
    %c0_i32_1 = arith.constant 0 : i32
    return %c0_i32, %c0_i32_0 : i32, i32
  }
  func.func @transform_5(%arg0: i32) -> (i32, i32) {
    %c0_i32 = arith.constant 0 : i32
    %c0_i32_0 = arith.constant 0 : i32
    %c0_i32_1 = arith.constant 0 : i32
    return %c0_i32, %c0_i32_0 : i32, i32
  }
  func.func @transform_6(%arg0: i32) -> (i32, i32) {
    %c0_i32 = arith.constant 0 : i32
    %c0_i32_0 = arith.constant 0 : i32
    %c0_i32_1 = arith.constant 0 : i32
    return %c0_i32, %c0_i32_0 : i32, i32
  }
  func.func @transform_7(%arg0: i32) -> (i32, i32) {
    %c0_i32 = arith.constant 0 : i32
    %c0_i32_0 = arith.constant 0 : i32
    return %c0_i32, %arg0 : i32, i32
  }
}

</mosaic_0001>

<bundles_post_ra>
// kernel: simple_nn_forward.1
= control target key start
LH: loop header
LB: loop body
LE: loop exit
PB: predicated region body
PF: predicated region fallthrough
CT: control target
= control target key end

     0   :  { %s783_s26 = smov 0   ;;  %s850_s0 = inlined_call_operand.vmem [shape: bf16[3,512], index: 0, kind: input, shape index: {}]   ;;  %s851_s1 = inlined_call_operand.vmem [shape: bf16[32,3], index: 1, kind: input, shape index: {}]   ;;  %s852_s2 = inlined_call_operand.vmem [shape: f32[32,1], index: 2, kind: input, shape index: {}]   ;;  %s853_s3 = inlined_call_operand.vmem [shape: bf16[30,32], index: 3, kind: input, shape index: {}]   ;;  %s854_s4 = inlined_call_operand.vmem [shape: f32[30,1], index: 4, kind: input, shape index: {}]   ;;  %s855_s5 = inlined_call_operand.vmem [shape: bf16[1,30], index: 5, kind: input, shape index: {}]   ;;  %s856_s6 = inlined_call_operand.<no memory space> [shape: f32[1,1], index: 6, kind: input, shape index: {}]   ;;  %s857_s7 = inlined_call_operand.vmem [shape: f32[1,512], index: 7, kind: output, shape index: {}]  }
   0x1   :  { %v12_v0 = vstv %s856_s6 }
   0x2   :  { %13 = vst [vmem:[#allocation2] sm:$0x1] %v12_v0 }
   0x3 LB: > { %s659_s27 = sadd.s32 4294967295, %s735_s26   ;;  %p663_p0 = scmp.ge.s32.totalorder %s735_s26, 1  ;;  %s735_s26 = sphi %s783_s26, %s19_s26  }
   0x4   : > { %p240_p1 = scmp.lt.s32.totalorder %s735_s26, 3 }
   0x6   : > { %p241_p2 = pnand %p663_p0, %p240_p1 }
   0x7   : > { %s664_s28 = sshll.u32 (!%p241_p2), %s659_s27, 1 }
   0x8   : > { %244 = sbr.rel (%p241_p2) target bundleno = 695 (0x2b7), region = 48  ;;  %p272_p3 = scmp.lt.s32.totalorder (!%p241_p2), %s664_s28, 3 }
   0xd   : > { %vm338_vm0 = vcmask 1040384   ;;  %v737_v1 = vmov 0   ;;  %s859_s28 = smov (!%p272_p3, %s664_s28), 3  ;;  %vm339_vm1 = vcmask 1041408   ;;  %v738_v2 = vmov 65535   ;;  %v290_v4 = vld [vmem:[%s852_s2 + $0x10] sm:$0xff] }
   0xe   : > { %380 = vmatprep.mubr.bf16.mxu0 %v737_v1  ;;  %691 = vset.pattern.permute.xlu0 %v737_v1  ;;  %v340_v3 = vsel %vm338_vm0, 4294967295, %v738_v2  ;;  %v288_v5 = vld [vmem:[%s852_s2] sm:$0xff]  ;;  %s665_s9 = sshll.u32 %s859_s28, 1  ;;  %v291_v6 = vld [vmem:[%s852_s2 + $0x18] sm:$0xff]  ;;  %v289_v8 = vld [vmem:[%s852_s2 + $0x8] sm:$0xff]  ;;  %vm331_vm2 = vcmask 23552   ;;  %s280_s15 = scalar_lea.vmem %s857_s7, %s859_s28 }
   0xf   : > { %692 = vset.pattern.permute.xlu1 %v737_v1  ;;  %490 = vmatprep.mubr.bf16.mxu1 %v737_v1  ;;  %s275_s14 = scalar_lea.vmem %s850_s0, %s665_s9  ;;  %v341_v7 = vsel %vm339_vm1, %v340_v3, 0  ;;  %v419_v12 = vld [vmem:[%s854_s4 + $0x10] sm:$0xff]  ;;  %v420_v14 = vld [vmem:[%s854_s4 + $0x18] sm:$0x3f]  ;;  %v693_v15 = vld [vmem:[%s851_s1] sm:$0xff]   ;;  %vm451_vm3 = vcmask 261120  }
  0x10   : > { %304 = vperm.xlu0 %691, %v290_v4   ;;  %294 = vperm.xlu1 %692, %v288_v5   ;;  %v669_v9 = vld.sshfl [vmem:[%s275_s14] sm:$0x33 pattern:$0x76325410]  ;;  %v418_v17 = vld [vmem:[%s854_s4 + $0x8] sm:$0xff]  ;;  %vm538_vm4 = vcmask 1046528  }
  0x11   : > { %v330_v10 = vcombine.high %v669_v9, %v669_v9  ;;  %v343_v11 = vand.u32 %v669_v9, %v341_v7  ;;  %v417_v16 = vld [vmem:[%s854_s4] sm:$0xff]  ;;  %v694_v19 = vld [vmem:[%s851_s1 + $0x8] sm:$0xff]   ;;  %vm534_vm5 = vcmask 244736  }
  0x12   : > { %v524_v18 = vld [vmem:[#allocation2] sm:$0x1]  ;;  %v696_v53 = vld [vmem:[%s853_s3 + $0x8] sm:$0x7f]  }
  0x13   : > { %v346_v13 = vand.u32 %v341_v7, %v330_v10  ;;  %v695_v52 = vld [vmem:[%s853_s3] sm:$0xff]  }
  0x14   : > { %309 = vperm.xlu0 %691, %v291_v6   ;;  %299 = vperm.xlu1 %692, %v289_v8  }
  0x15   : > { %362 = vmatprep.subr.bf16.mxu0 %v346_v13 }
  0x16   : > { %363 = vmatpush1.bf16.msra.mxu0 %v343_v11 }
  0x18   : > { %433 = vperm.xlu0 %691, %v419_v12   ;;  %438 = vperm.xlu1 %692, %v420_v14  }
  0x19   : > { %670 = vmatmul.mubr.msk.bf16.vlgmr.msra.gmra.mxu0 %vm331_vm2, %v693_v15 }
  0x1a   : > { %390 = vmatprep.mubr.bf16.mxu0 %v737_v1 }
  0x1c   : > { %423 = vperm.xlu0 %691, %v417_v16   ;;  %428 = vperm.xlu1 %692, %v418_v17  }
  0x20   : > { %527 = vperm.xlu0 %691, %v524_v18  }
  0x21   : > { %671 = vmatmul.mubr.msk.bf16.gmra.mxu0 %vm331_vm2, %v694_v19 }
  0x22   : > { %577 = vmatprep.mubr.bf16.mxu0 %v737_v1 }
  0x8b   : > { %v295_v22 = vpop.permute.xlu1 %294  ;;  %v305_v24 = vpop.permute.xlu0 %304 }
  0x8f   : > { %v300_v27 = vpop.permute.xlu1 %299  ;;  %v310_v31 = vpop.permute.xlu0 %309 }
  0x93   : > { %v439_v55 = vpop.permute.xlu1 %438  ;;  %v434_v59 = vpop.permute.xlu0 %433 }
  0x97   : > { %v429_v60 = vpop.permute.xlu1 %428  ;;  %v424_v4 = vpop.permute.xlu0 %423 }
  0xd9   : > { %v382_v20 = vpop.f32.mrf.mxu0 }
  0xda   : > { %v383_v39 = vadd.f32 %v382_v20, %v295_v22 }
  0xdb   : > { %v384_v21 = vpop.f32.mrf.mxu0 }
  0xdc   : > { %v385_v36 = vadd.f32 %v384_v21, %v295_v22 }
  0xdd   : > { %v386_v23 = vpop.f32.mrf.mxu0 }
  0xde   : > { %v387_v38 = vadd.f32 %v386_v23, %v300_v27  ;;  %v519_v23 = vld [vmem:[%s855_s5] sm:$0x1] }
  0xdf   : > { %v388_v25 = vpop.f32.mrf.mxu0 }
  0xe0   : > { %v389_v28 = vadd.f32 %v388_v25, %v300_v27 }
  0xe1   : > { %v392_v26 = vpop.f32.mrf.mxu0 }
  0xe2   : > { %697 = vtanh.f32 %v389_v28  ;;  %v393_v34 = vadd.f32 %v392_v26, %v305_v24  ;;  %v739_v26 = vmov 1966171168  }
  0xe3   : > { %v394_v29 = vpop.f32.mrf.mxu0  ;;  %v590_v27 = vunpack.c.l.s4 %v739_v26 }
  0xe4   : > { %v395_v30 = vadd.f32 %v394_v29, %v305_v24  ;;  %v530_v24 = vlaneseq  ;;  %v528_v29 = vpop.permute.xlu0 %527 }
  0xe5   : > { %v396_v32 = vpop.f32.mrf.mxu0 }
  0xe6   : > { %v397_v33 = vadd.f32 %v396_v32, %v310_v31  ;;  %699 = vtanh.f32 %v395_v30  ;;  %v531_v25 = vshrl.u32 %v530_v24, 7  ;;  %v591_v30 = vunpack.c.0.s8 %v590_v27 }
  0xe7   : > { %v398_v35 = vpop.f32.mrf.mxu0  ;;  %vm606_vm6 = vcmp.lt.s32.totalorder %v530_v24, 256 }
  0xe8   : > { %v399_v37 = vadd.f32 %v398_v35, %v310_v31  ;;  %701 = vtanh.f32 %v397_v33  ;;  %v532_v28 = vsub.s32 0, %v531_v25 }
  0xea   : > { %703 = vtanh.f32 %v399_v37  ;;  %v533_v32 = vrot.slane %v528_v29, %v532_v28 }
  0xeb   : > { %705 = vtanh.f32 %v393_v34 }
  0xec   : > { %707 = vtanh.f32 %v385_v36  ;;  %v594_v36 = vsub.s32 %v591_v30, %v531_v25 }
  0xed   : > { %709 = vtanh.f32 %v387_v38 }
  0xee   : > { %711 = vtanh.f32 %v383_v39 }
  0xef   : > { %v698_v40 = vpop.eup %697 }
  0xf3   : > { %v700_v41 = vpop.eup %699 }
  0xf5   : > { %v702_v42 = vpop.eup %701 }
  0xf7   : > { %v704_v43 = vpop.eup %703 }
  0xf8   : > { %v706_v44 = vpop.eup %705  ;;  %v416_v45 = vpack.c.bf16 %v704_v43, %v700_v41 }
  0xf9   : > { %v708_v46 = vpop.eup %707  ;;  %v415_v47 = vpack.c.bf16 %v702_v42, %v706_v44 }
  0xfa   : > { %v710_v48 = vpop.eup %709  ;;  %470 = vmatprep.subr.bf16.mxu1 %v416_v45  ;;  %v414_v49 = vpack.c.bf16 %v698_v40, %v708_v46 }
  0xfb   : > { %471 = vmatpush1.bf16.msra.mxu1 %v415_v47  ;;  %v712_v50 = vpop.eup %711 }
  0xfc   : > { %472 = vmatprep.subr.bf16.mxu1 %v414_v49  ;;  %v413_v51 = vpack.c.bf16 %v710_v48, %v712_v50 }
  0xff   : > { %473 = vmatpush1.bf16.msra.mxu1 %v413_v51 }
 0x102   : > { %674 = vmatmul.mubr.msk.bf16.vlgmr.msra.gmra.mxu1 %vm451_vm3, %v695_v52 }
 0x103   : > { %500 = vmatprep.mubr.bf16.mxu1 %v737_v1 }
 0x10a   : > { %675 = vmatmul.mubr.msk.bf16.gmra.mxu1 %vm451_vm3, %v696_v53 }
 0x1c2   : > { %v492_v54 = vpop.f32.mrf.mxu1 }
 0x1c3   : > { %v493_v9 = vadd.f32 %v492_v54, %v424_v4 }
 0x1c4   : > { %v494_v56 = vpop.f32.mrf.mxu1 }
 0x1c5   : > { %v495_v6 = vadd.f32 %v494_v56, %v424_v4 }
 0x1c6   : > { %v496_v57 = vpop.f32.mrf.mxu1 }
 0x1c7   : > { %v497_v8 = vadd.f32 %v496_v57, %v429_v60 }
 0x1c8   : > { %v498_v58 = vpop.f32.mrf.mxu1 }
 0x1c9   : > { %v499_v62 = vadd.f32 %v498_v58, %v429_v60 }
 0x1ca   : > { %v502_v61 = vpop.f32.mrf.mxu1 }
 0x1cb   : > { %v503_v63 = vadd.f32 %v502_v61, %v434_v59  ;;  %713 = vtanh.f32 %v499_v62 }
 0x1cc   : > { %v504_v0 = vpop.f32.mrf.mxu1 }
 0x1cd   : > { %v505_v2 = vadd.f32 %v504_v0, %v434_v59  ;;  %715 = vtanh.f32 %v503_v63 }
 0x1ce   : > { %v506_v3 = vpop.f32.mrf.mxu1 }
 0x1cf   : > { %v507_v1 = vadd.f32 %v506_v3, %v439_v55 }
 0x1d0   : > { %v508_v5 = vpop.f32.mrf.mxu1 }
 0x1d1   : > { %717 = vtanh.f32 %v507_v1  ;;  %v509_v7 = vadd.f32 %v508_v5, %v439_v55 }
 0x1d2   : > { %719 = vtanh.f32 %v505_v2 }
 0x1d3   : > { %721 = vtanh.f32 %v509_v7 }
 0x1d4   : > { %723 = vtanh.f32 %v495_v6 }
 0x1d5   : > { %725 = vtanh.f32 %v497_v8 }
 0x1d6   : > { %727 = vtanh.f32 %v493_v9 }
 0x1d8   : > { %v714_v10 = vpop.eup %713 }
 0x1da   : > { %v716_v11 = vpop.eup %715 }
 0x1de   : > { %v718_v12 = vpop.eup %717 }
 0x1df   : > { %v720_v13 = vpop.eup %719  ;;  %v522_v14 = vpack.c.bf16 %v718_v12, %v716_v11 }
 0x1e0   : > { %v722_v15 = vpop.eup %721 }
 0x1e1   : > { %v523_v16 = vpack.c.bf16 %v722_v15, %v720_v13  ;;  %v724_v17 = vpop.eup %723  ;;  %v540_v19 = vsel %vm538_vm4, %v522_v14, 0 }
 0x1e2   : > { %v726_v18 = vpop.eup %725  ;;  %v521_v20 = vpack.c.bf16 %v714_v10, %v724_v17 }
 0x1e3   : > { %676 = vmatprep.subr.msk.bf16.mxu0 %vm538_vm4, %v523_v16  ;;  %v728_v21 = vpop.eup %727 }
 0x1e4   : > { %558 = vmatpush1.bf16.msra.mxu0 %v540_v19  ;;  %v520_v22 = vpack.c.bf16 %v726_v18, %v728_v21 }
 0x1e5   : > { %559 = vmatprep.subr.bf16.mxu0 %v521_v20 }
 0x1e8   : > { %560 = vmatpush1.bf16.msra.mxu0 %v520_v22 }
 0x1eb   : > { %677 = vmatmul.mubr.msk.bf16.vlgmr.msra.gmra.mxu0 %vm534_vm5, %v519_v23 }
 0x2ab   : > { %v579_v31 = vpop.f32.mrf.mxu0 }
 0x2ac   : > { %v580_v34 = vadd.f32 %v579_v31, %v533_v32 }
 0x2ad   : > { %v581_v33 = vpop.f32.mrf.mxu0 }
 0x2ae   : > { %v582_v35 = vadd.f32 %v581_v33, %v533_v32 }
 0x2af   : > { %v583_v37 = vpop.f32.mrf.mxu0 }
 0x2b0   : > { %v588_v38 = vcombine.low %v580_v34, %v582_v35 }
 0x2b1   : > { %v584_v39 = vpop.f32.mrf.mxu0 }
 0x2b2   : > { %v595_v40 = vrot.slane %v588_v38, %v594_v36 }
 0x2b4   : > { %v602_v41 = vrot.slane %v595_v40, %v594_v36 }
 0x2b6   : > { %608 = vst.msk [vmem:[%s280_s15] sm:$0x3] %vm606_vm6, %v602_v41 }
 0x2b7 PF: > { %s19_s26 = sadd.s32 1, %s735_s26  }
 0x2b8   : > { %p16_p4 = scmp.ge.s32.totalorder %s19_s26, 4  }
 0x2ba   :  { %18 = sbr.rel (!%p16_p4) target bundleno = 3 (0x3), region = 78 }

</bundles_post_ra>
